<compile_context>
chip_gen: v6e
topology: v6e:2x2x1
jax: 0.10.0
libtpu: 0.0.40
codegen_flags: <defaults>
</compile_context>

<pallas_src>
import math

import jax
import jax.numpy as jnp
from jax.experimental import pallas as pl
from jax.experimental.pallas import tpu as pltpu


def _pe_add_kernel(x_ref, pe_ref, o_ref):
    # x_ref: (tile_t, B, E); pe_ref: (tile_t, 1, E) -> broadcast over the batch (sublane) axis.
    o_ref[...] = (x_ref[...] + pe_ref[...]).astype(o_ref.dtype)


def make_positional_encoding(d_model, max_len=5000, dtype=jnp.float32):
    """Sinusoidal PE buffer, shape [max_len, 1, d_model] (same layout as the PyTorch buffer)."""
    position = jnp.arange(max_len, dtype=jnp.float32)[:, None]                      # [max_len, 1]
    div_term = jnp.exp(
        -math.log(10000.0) * jnp.arange(0, d_model, 2, dtype=jnp.float32) / d_model
    )                                                                               # [ceil(E/2)]
    angles = position * div_term[None, :]                                           # [max_len, ceil(E/2)]
    pe = jnp.zeros((max_len, d_model), jnp.float32)
    pe = pe.at[:, 0::2].set(jnp.sin(angles))
    pe = pe.at[:, 1::2].set(jnp.cos(angles)[:, : d_model // 2])
    return pe[:, None, :].astype(dtype)                                             # [max_len, 1, d_model]


def positional_encoding_forward(x, pe, *, target_block_bytes=2 * 1024 * 1024):
    """x: [T, B, E] (seq-first, like the PyTorch module). pe: [max_len, 1, E].
    Returns x + pe[:T] (eval-mode forward; dropout is identity at inference).

    Tiling: this op is purely HBM-bandwidth bound, so we tile only the sequence axis with
    blocks of ~target_block_bytes (full, lane-dense (B, E) trailing dims -> unmasked vst),
    mark the grid axis "parallel" (v7x megacore), and let BlockSpec double-buffer the DMA.
    """
    T, B, E = x.shape
    assert pe.shape[0] >= T and pe.shape[2] == E, "pe buffer too short / wrong d_model"
    pe_t = pe[:T].astype(x.dtype)  # [T, 1, E] — cast once outside the kernel to save HBM traffic

    # Pick the largest seq tile that keeps the x block near target_block_bytes.
    row_bytes = B * E * x.dtype.itemsize
    tile_t = max(1, min(T, target_block_bytes // max(row_bytes, 1)))
    grid = (pl.cdiv(T, tile_t),)

    cost = pl.CostEstimate(
        flops=T * B * E,  # one add per element
        transcendentals=0,
        bytes_accessed=2 * x.size * x.dtype.itemsize + pe_t.size * pe_t.dtype.itemsize,
    )

    return pl.pallas_call(
        _pe_add_kernel,
        out_shape=jax.ShapeDtypeStruct((T, B, E), x.dtype),
        grid_spec=pltpu.PrefetchScalarGridSpec(
            num_scalar_prefetch=0,
            grid=grid,
            in_specs=[
                pl.BlockSpec((tile_t, B, E), lambda i: (i, 0, 0)),  # x tile (full B, E -> lane-dense)
                pl.BlockSpec((tile_t, 1, E), lambda i: (i, 0, 0)),  # pe tile (broadcast over B in-kernel)
            ],
            out_specs=pl.BlockSpec((tile_t, B, E), lambda i: (i, 0, 0)),
        ),
        compiler_params=pltpu.CompilerParams(
            dimension_semantics=("parallel",),     # megacore-shardable on v7x; many steps for real T
            vmem_limit_bytes=48 * 1024 * 1024,     # headroom for big tiles; still safe on v7x (64 MiB)
        ),
        cost_estimate=cost,
    )(x, pe_t)


if __name__ == "__main__":
    # Small demo shapes consistent with the module: seq-first [T, B, E], lane-dense d_model.
    T, B, E = 8, 4, 128
    max_len = 64

    key = jax.random.PRNGKey(0)
    x = jax.random.normal(key, (T, B, E), jnp.float32)
    pe = make_positional_encoding(E, max_len=max_len, dtype=jnp.float32)

    out = positional_encoding_forward(x, pe)
    jax.block_until_ready(out)

    # Reference check in plain JAX (eval-mode forward: x + pe[:T], dropout identity).
    ref = x + pe[:T]
    assert out.shape == (T, B, E)
    assert jnp.allclose(out, ref, atol=1e-6, rtol=1e-6), "mismatch vs reference"
    print("KERNEL_OK")
</pallas_src>

<mosaic_0001>
module attributes {stable_mosaic.version = 11 : i64} {
  func.func @_pe_add_kernel(%arg0: i32, %arg1: memref<8x4x128xf32, #tpu.memory_space<vmem>>, %arg2: memref<8x1x128xf32, #tpu.memory_space<vmem>>, %arg3: memref<8x4x128xf32, #tpu.memory_space<vmem>>) attributes {dimension_semantics = [#tpu.dimension_semantics<parallel>], iteration_bounds = array<i64: 1>, scalar_prefetch = 0 : i64, scratch_operands = 0 : i64, tpu.core_type = #tpu.core_type<tc>, window_params = [{transform_indices = @transform_0, window_bounds = array<i64: 8, 4, 128>}, {transform_indices = @transform_1, window_bounds = array<i64: 8, 1, 128>}, {transform_indices = @transform_2, window_bounds = array<i64: 8, 4, 128>}]} {
    %c0 = arith.constant 0 : index
    %c0_0 = arith.constant 0 : index
    %c0_1 = arith.constant 0 : index
    %0 = vector.load %arg1[%c0, %c0_0, %c0_1] : memref<8x4x128xf32, #tpu.memory_space<vmem>>, vector<8x4x128xf32>
    %c0_2 = arith.constant 0 : index
    %c0_3 = arith.constant 0 : index
    %c0_4 = arith.constant 0 : index
    %1 = vector.load %arg2[%c0_2, %c0_3, %c0_4] : memref<8x1x128xf32, #tpu.memory_space<vmem>>, vector<8x1x128xf32>
    %2 = vector.broadcast %1 : vector<8x1x128xf32> to vector<8x4x128xf32>
    %3 = arith.addf %0, %2 : vector<8x4x128xf32>
    %c0_5 = arith.constant 0 : index
    %c0_6 = arith.constant 0 : index
    %c0_7 = arith.constant 0 : index
    %4 = vector.load %arg3[%c0_5, %c0_6, %c0_7] : memref<8x4x128xf32, #tpu.memory_space<vmem>>, vector<8x4x128xf32>
    tpu.vector_store %arg3[%c0_5, %c0_6, %c0_7], %3 {strides = array<i32>} : memref<8x4x128xf32, #tpu.memory_space<vmem>>, vector<8x4x128xf32>,
    return
  }
  func.func @transform_0(%arg0: i32) -> (i32, i32, i32) {
    %c0_i32 = arith.constant 0 : i32
    %c0_i32_0 = arith.constant 0 : i32
    %c0_i32_1 = arith.constant 0 : i32
    return %arg0, %c0_i32, %c0_i32_0 : i32, i32, i32
  }
  func.func @transform_1(%arg0: i32) -> (i32, i32, i32) {
    %c0_i32 = arith.constant 0 : i32
    %c0_i32_0 = arith.constant 0 : i32
    %c0_i32_1 = arith.constant 0 : i32
    return %arg0, %c0_i32, %c0_i32_0 : i32, i32, i32
  }
  func.func @transform_2(%arg0: i32) -> (i32, i32, i32) {
    %c0_i32 = arith.constant 0 : i32
    %c0_i32_0 = arith.constant 0 : i32
    %c0_i32_1 = arith.constant 0 : i32
    return %arg0, %c0_i32, %c0_i32_0 : i32, i32, i32
  }
}

</mosaic_0001>

<bundles_post_ra>
// kernel: tpu_custom_call.1
= control target key start
LH: loop header
LB: loop body
LE: loop exit
PB: predicated region body
PF: predicated region fallthrough
CT: control target
= control target key end

     0   :  { %7 = vsyncpa [#allocation3], 0  ;;  %s259_s0 = inlined_call_operand.hbm [shape: f32[8,4,128], index: 0, kind: input, shape index: {}]   ;;  %s260_s1 = inlined_call_operand.hbm [shape: f32[8,1,128], index: 1, kind: input, shape index: {}]   ;;  %s261_s2 = inlined_call_operand.hbm [shape: f32[8,4,128], index: 2, kind: output, shape index: {}]  }
   0x1   :  { %8 = vsyncpa [#allocation6], 0 }
   0x2   :  { %9 = vsyncpa [#allocation4], 0  ;;  %s219_s9 = smov [#allocation2]  }
   0x3   :  { %s15_s10 = sshll.u32 %s219_s9, 4  ;;  %s16_s10 = int_to_ptr.vmem [resolvable:$true] %s15_s10 }
   0x4   :  { %s161_s11 = scalar_lea.vmem %s16_s10, 512  ;;  %p166_p1 = scmp.lt.s32.totalorder %s16_s10, %s16_s10 }
   0x5   :  { %p162_p0 = scmp.ne.s32.totalorder %s16_s10, %s161_s11  ;;  %p167_p2 = scmp.lt.s32.totalorder %s161_s11, %s161_s11 }
   0x7   :  { %p168_p3 = por %p167_p2, %p166_p1 }
   0x9   :  { %p169_p4 = pnand %p168_p3, %p162_p0 }
   0xb   :  { %172 = shalt.err (!%p169_p4)
}
   0xc   :  { %s220_s12 = smov 64   ;;  %s221_s13 = smov 4  }
   0xd   :  { %21 = dma.hbm_to_vmem [thread:$0]  %s259_s0, 512, %s16_s10, [#allocation3], %s220_s12, %s220_s12, %s221_s13  }
   0xe   :  { %s222_s16 = smov [#allocation5]  }
   0xf   :  { %s27_s17 = sshll.u32 %s222_s16, 4  ;;  %s28_s17 = int_to_ptr.vmem [resolvable:$true] %s27_s17 }
  0x10   :  { %s181_s18 = scalar_lea.vmem %s28_s17, 128  ;;  %p186_p6 = scmp.lt.s32.totalorder %s28_s17, %s28_s17 }
  0x11   :  { %p182_p5 = scmp.ne.s32.totalorder %s28_s17, %s181_s18  ;;  %p187_p7 = scmp.lt.s32.totalorder %s181_s18, %s181_s18 }
  0x13   :  { %p188_p8 = por %p187_p7, %p186_p6 }
  0x15   :  { %p189_p9 = pnand %p188_p8, %p182_p5 }
  0x17   :  { %192 = shalt.err (!%p189_p9)
}
  0x18   :  { %s223_s19 = smov 16   ;;  %s224_s20 = smov 1  }
  0x19   :  { %33 = dma.hbm_to_vmem [thread:$0]  %s260_s1, 128, %s28_s17, [#allocation6], %s223_s19, %s223_s19, %s224_s20  }
  0x1a   :  { %213 = dma.done.wait [#allocation3], 512  }
  0x1b   :  { %214 = vsyncadd [#allocation3], 4294966784 }
  0x1c   :  { %215 = dma.done.wait [#allocation6], 128  }
  0x1d   :  { %216 = vsyncadd [#allocation6], 4294967168  ;;  %s225_s0 = smov [#allocation7]   ;;  %v40_v0 = vld [vmem:[#allocation2] sm:$0xf] }
  0x1e   :  { %s250_s23 = sshll.u32 %s225_s0, 4  ;;  %v138_v1 = vld [vmem:[#allocation5] ss:$0 sm:$0xff]  ;;  %v41_v2 = vld [vmem:[#allocation2 + $0x4] sm:$0xf]  ;;  %s126_s23 = int_to_ptr.vmem [resolvable:$true] %s250_s23 }
  0x1f   :  { %v104_v3 = vadd.f32 %v138_v1, %v40_v0  ;;  %v139_v4 = vld [vmem:[#allocation5 + $0x1] ss:$0 sm:$0xff]  ;;  %v42_v5 = vld [vmem:[#allocation2 + $0x8] sm:$0xf]  ;;  %v140_v6 = vld [vmem:[#allocation5 + $0x2] ss:$0 sm:$0xff]  ;;  %p198_p11 = scmp.lt.s32.totalorder %s126_s23, %s126_s23 }
  0x20   :  { %v105_v7 = vadd.f32 %v139_v4, %v41_v2  ;;  %v106_v8 = vadd.f32 %v140_v6, %v42_v5  ;;  %v43_v9 = vld [vmem:[#allocation2 + $0xc] sm:$0xf]  ;;  %v141_v10 = vld [vmem:[#allocation5 + $0x3] ss:$0 sm:$0xff]  ;;  %v44_v11 = vld [vmem:[#allocation2 + $0x10] sm:$0xf] }
  0x21   :  { %112 = vst [vmem:[#allocation7] sm:$0xf] %v104_v3  ;;  %v107_v12 = vadd.f32 %v141_v10, %v43_v9  ;;  %v142_v13 = vld [vmem:[#allocation5 + $0x4] ss:$0 sm:$0xff]  ;;  %v45_v14 = vld [vmem:[#allocation2 + $0x14] sm:$0xf] }
  0x22   :  { %v143_v15 = vld [vmem:[#allocation5 + $0x5] ss:$0 sm:$0xff]  ;;  %113 = vst [vmem:[#allocation7 + $0x4] sm:$0xf] %v105_v7  ;;  %114 = vst [vmem:[#allocation7 + $0x8] sm:$0xf] %v106_v8  ;;  %v108_v16 = vadd.f32 %v142_v13, %v44_v11 }
  0x23   :  { %v109_v17 = vadd.f32 %v143_v15, %v45_v14  ;;  %v46_v18 = vld [vmem:[#allocation2 + $0x18] sm:$0xf]  ;;  %v144_v19 = vld [vmem:[#allocation5 + $0x6] ss:$0 sm:$0xff]  ;;  %v47_v20 = vld [vmem:[#allocation2 + $0x1c] sm:$0xf] }
  0x24   :  { %115 = vst [vmem:[#allocation7 + $0xc] sm:$0xf] %v107_v12  ;;  %v110_v21 = vadd.f32 %v144_v19, %v46_v18  ;;  %v145_v22 = vld [vmem:[#allocation5 + $0x7] ss:$0 sm:$0xff]  ;;  %116 = vst [vmem:[#allocation7 + $0x10] sm:$0xf] %v108_v16 }
  0x25   :  { %117 = vst [vmem:[#allocation7 + $0x14] sm:$0xf] %v109_v17  ;;  %v111_v23 = vadd.f32 %v145_v22, %v47_v20  ;;  %s193_s1 = scalar_lea.vmem %s126_s23, 512 }
  0x26   :  { %118 = vst [vmem:[#allocation7 + $0x18] sm:$0xf] %v110_v21  ;;  %p194_p10 = scmp.ne.s32.totalorder %s126_s23, %s193_s1  ;;  %p199_p12 = scmp.lt.s32.totalorder %s193_s1, %s193_s1 }
  0x27   :  { %119 = vst [vmem:[#allocation7 + $0x1c] sm:$0xf] %v111_v23 }
  0x28   :  { %p200_p13 = por %p199_p12, %p198_p11 }
  0x2a   :  { %p201_p0 = pnand %p200_p13, %p194_p10 }
  0x2c   :  { %204 = shalt.err (!%p201_p0)
}
  0x2d   :  { %131 = dma.vmem_to_hbm [thread:$0]  %s126_s23, 512, %s261_s2, [#allocation4], %s220_s12, %s220_s12, %s221_s13  }
  0x2e   :  { %217 = dma.done.wait [#allocation4], 512  }
  0x2f   :  { %218 = vsyncadd [#allocation4], 4294966784 }
  0x30   :  { %135 = vsyncpa [#allocation3], 1 }
  0x31   :  { %136 = vsyncpa [#allocation6], 1 }
  0x32   :  { %137 = vsyncpa [#allocation4], 1 }

</bundles_post_ra>
